<compile_context>
chip_gen: v7x
topology: tpu7x:2x2x1
jax: 0.10.0
libtpu: 0.0.40
codegen_flags: <defaults>
</compile_context>

<pallas_src>
import jax
import jax.numpy as jnp
from jax.experimental import pallas as pl
from jax.experimental.pallas import tpu as pltpu

_LANE = 128
_SUBLANE = 8


def _rmse_partial_kernel(yhat_ref, y_ref, o_ref, acc_ref):
    """Accumulates per-lane sum of (yhat - y)^2 over the reduction axis."""
    k = pl.program_id(1)

    @pl.when(k == 0)
    def _():
        acc_ref[...] = jnp.zeros_like(acc_ref)

    d = yhat_ref[...].astype(jnp.float32) - y_ref[...].astype(jnp.float32)
    sq = d * d
    # Fold (tile_rows, 128) -> (tile_rows//8, 8, 128) and sum the leading
    # (vreg-batch) axis: pure VPU adds, keeps per-lane partial sums.
    acc_ref[...] += jnp.sum(sq.reshape(-1, _SUBLANE, _LANE), axis=0)

    @pl.when(k == pl.num_programs(1) - 1)
    def _():
        # Lane-dense (8,128) partial-sum writeback; final reduce happens in JAX.
        o_ref[...] = acc_ref[...]


def rmse_loss(yhat, y, eps=1e-6, target_tile_bytes=1 << 20):
    """loss = sqrt(mean((yhat - y)^2) + eps), computed with a Pallas kernel."""
    assert yhat.shape == y.shape, "yhat and y must have the same shape"
    n = yhat.size
    flat_h = yhat.reshape(-1)
    flat_y = y.reshape(-1)

    itemsize = jnp.dtype(yhat.dtype).itemsize
    # ~1 MiB per input tile, rounded to a multiple of 8 rows.
    target_rows = max(
        _SUBLANE, (target_tile_bytes // (_LANE * itemsize)) // _SUBLANE * _SUBLANE
    )

    rows_all = n // _LANE
    if rows_all >= _SUBLANE:
        # No padding / no input copies: the kernel covers whole tiles; the
        # ragged remainder (< one tile) is reduced with plain jnp below.
        tile_rows = min(target_rows, (rows_all // _SUBLANE) * _SUBLANE)
        num_tiles = rows_all // tile_rows
        main_elems = num_tiles * tile_rows * _LANE
        if main_elems == n:
            main_h, main_y = flat_h, flat_y
            tail_h = tail_y = None
        else:
            main_h = flat_h[:main_elems]
            main_y = flat_y[:main_elems]
            tail_h = flat_h[main_elems:]
            tail_y = flat_y[main_elems:]
    else:
        # Tiny input: pad (cheap at this size) up to a single (8,128) tile.
        # Zero padding adds 0 to the sum; the mean divides by the true n.
        pad = _SUBLANE * _LANE - n
        main_h = jnp.pad(flat_h, (0, pad))
        main_y = jnp.pad(flat_y, (0, pad))
        tail_h = tail_y = None
        tile_rows = _SUBLANE
        num_tiles = 1

    a = main_h.reshape(num_tiles * tile_rows, _LANE)
    b = main_y.reshape(num_tiles * tile_rows, _LANE)

    # Shard the tile range across 2 TensorCores (v7x) when it divides evenly;
    # on single-core chips the extra leading axis just iterates (negligible).
    num_par = 2 if (num_tiles >= 2 and num_tiles % 2 == 0) else 1
    steps = num_tiles // num_par

    partials = pl.pallas_call(
        _rmse_partial_kernel,
        out_shape=jax.ShapeDtypeStruct((num_par * _SUBLANE, _LANE), jnp.float32),
        grid_spec=pltpu.PrefetchScalarGridSpec(
            num_scalar_prefetch=0,
            grid=(num_par, steps),
            in_specs=[
                pl.BlockSpec((tile_rows, _LANE), lambda p, k: (p * steps + k, 0)),
                pl.BlockSpec((tile_rows, _LANE), lambda p, k: (p * steps + k, 0)),
            ],
            out_specs=pl.BlockSpec((_SUBLANE, _LANE), lambda p, k: (p, 0)),
            scratch_shapes=[pltpu.VMEM((_SUBLANE, _LANE), jnp.float32)],
        ),
        compiler_params=pltpu.CompilerParams(
            dimension_semantics=("parallel", "arbitrary"),
        ),
    )(a, b)

    total_sq = jnp.sum(partials)
    if tail_h is not None:
        td = tail_h.astype(jnp.float32) - tail_y.astype(jnp.float32)
        total_sq = total_sq + jnp.sum(td * td)

    return jnp.sqrt(total_sq / jnp.float32(n) + jnp.float32(eps))


if __name__ == "__main__":
    key = jax.random.PRNGKey(0)
    k1, k2, k3, k4 = jax.random.split(key, 4)

    # Small NCHW-shaped example inputs (the loss itself is shape-agnostic).
    x_shape = (2, 4, 16, 16)
    yhat = jax.random.normal(k1, x_shape, dtype=jnp.float32)
    y = jax.random.normal(k2, x_shape, dtype=jnp.float32)

    loss = rmse_loss(yhat, y, eps=1e-6)
    loss = jax.block_until_ready(loss)

    ref = jnp.sqrt(jnp.mean((yhat - y) ** 2) + 1e-6)
    assert jnp.allclose(loss, ref, rtol=1e-5, atol=1e-6), (loss, ref)

    # Secondary check: ragged size exercises the no-pad main + JAX-tail path.
    r_shape = (2, 4, 16, 17)
    yhat2 = jax.random.normal(k3, r_shape, dtype=jnp.float32)
    y2 = jax.random.normal(k4, r_shape, dtype=jnp.float32)
    loss2 = jax.block_until_ready(rmse_loss(yhat2, y2, eps=1e-6))
    ref2 = jnp.sqrt(jnp.mean((yhat2 - y2) ** 2) + 1e-6)
    assert jnp.allclose(loss2, ref2, rtol=1e-5, atol=1e-6), (loss2, ref2)

    print("KERNEL_OK")
</pallas_src>

<mosaic_0001>
module attributes {stable_mosaic.version = 11 : i64} {
  func.func @_rmse_partial_kernel(%arg0: i32, %arg1: i32, %arg2: memref<16x128xf32, #tpu.memory_space<vmem>>, %arg3: memref<16x128xf32, #tpu.memory_space<vmem>>, %arg4: memref<8x128xf32, #tpu.memory_space<vmem>>, %arg5: memref<8x128xf32, #tpu.memory_space<vmem>>) attributes {dimension_semantics = [#tpu.dimension_semantics<parallel>, #tpu.dimension_semantics<arbitrary>], iteration_bounds = array<i64: 1, 1>, scalar_prefetch = 0 : i64, scratch_operands = 1 : i64, tpu.core_type = #tpu.core_type<tc>, window_params = [{transform_indices = @transform_0, window_bounds = array<i64: 16, 128>}, {transform_indices = @transform_1, window_bounds = array<i64: 16, 128>}, {transform_indices = @transform_2, window_bounds = array<i64: 8, 128>}]} {
    %c0_i32 = arith.constant 0 : i32
    %0 = arith.cmpi eq, %arg1, %c0_i32 : i32
    %1 = arith.extui %0 : i1 to i32
    %c0_i32_0 = arith.constant 0 : i32
    %2 = arith.cmpi ne, %1, %c0_i32_0 : i32
    scf.if %2 {
      %cst_10 = arith.constant 0.000000e+00 : f32
      %15 = vector.broadcast %cst_10 : f32 to vector<8x128xf32>
      %c0_11 = arith.constant 0 : index
      %c0_12 = arith.constant 0 : index
      %16 = vector.load %arg5[%c0_11, %c0_12] : memref<8x128xf32, #tpu.memory_space<vmem>>, vector<8x128xf32>
      tpu.vector_store %arg5[%c0_11, %c0_12], %15 {strides = array<i32>} : memref<8x128xf32, #tpu.memory_space<vmem>>, vector<8x128xf32>,
    } else {
    }
    %c0 = arith.constant 0 : index
    %c0_1 = arith.constant 0 : index
    %3 = vector.load %arg2[%c0, %c0_1] : memref<16x128xf32, #tpu.memory_space<vmem>>, vector<16x128xf32>
    %c0_2 = arith.constant 0 : index
    %c0_3 = arith.constant 0 : index
    %4 = vector.load %arg3[%c0_2, %c0_3] : memref<16x128xf32, #tpu.memory_space<vmem>>, vector<16x128xf32>
    %5 = arith.subf %3, %4 : vector<16x128xf32>
    %6 = arith.mulf %5, %5 : vector<16x128xf32>
    %c0_4 = arith.constant 0 : index
    %c0_5 = arith.constant 0 : index
    %7 = vector.load %arg5[%c0_4, %c0_5] : memref<8x128xf32, #tpu.memory_space<vmem>>, vector<8x128xf32>
    %8 = vector.shape_cast %6 : vector<16x128xf32> to vector<2x8x128xf32>
    %cst = arith.constant dense<0.000000e+00> : vector<8x128xf32>
    %9 = vector.multi_reduction <add>, %8, %cst [0] : vector<2x8x128xf32> to vector<8x128xf32>
    %10 = arith.addf %7, %9 : vector<8x128xf32>
    %c0_6 = arith.constant 0 : index
    %c0_7 = arith.constant 0 : index
    %11 = vector.load %arg5[%c0_6, %c0_7] : memref<8x128xf32, #tpu.memory_space<vmem>>, vector<8x128xf32>
    tpu.vector_store %arg5[%c0_6, %c0_7], %10 {strides = array<i32>} : memref<8x128xf32, #tpu.memory_space<vmem>>, vector<8x128xf32>,
    %c0_i32_8 = arith.constant 0 : i32
    %12 = arith.cmpi eq, %arg1, %c0_i32_8 : i32
    %13 = arith.extui %12 : i1 to i32
    %c0_i32_9 = arith.constant 0 : i32
    %14 = arith.cmpi ne, %13, %c0_i32_9 : i32
    scf.if %14 {
      %c0_10 = arith.constant 0 : index
      %c0_11 = arith.constant 0 : index
      %15 = vector.load %arg5[%c0_10, %c0_11] : memref<8x128xf32, #tpu.memory_space<vmem>>, vector<8x128xf32>
      %c0_12 = arith.constant 0 : index
      %c0_13 = arith.constant 0 : index
      %16 = vector.load %arg4[%c0_12, %c0_13] : memref<8x128xf32, #tpu.memory_space<vmem>>, vector<8x128xf32>
      tpu.vector_store %arg4[%c0_12, %c0_13], %15 {strides = array<i32>} : memref<8x128xf32, #tpu.memory_space<vmem>>, vector<8x128xf32>,
    } else {
    }
    return
  }
  func.func @transform_0(%arg0: i32, %arg1: i32) -> (i32, i32) {
    %c1_i32 = arith.constant 1 : i32
    %0 = arith.muli %arg0, %c1_i32 : i32
    %1 = arith.addi %0, %arg1 : i32
    %c0_i32 = arith.constant 0 : i32
    %c0_i32_0 = arith.constant 0 : i32
    return %1, %c0_i32 : i32, i32
  }
  func.func @transform_1(%arg0: i32, %arg1: i32) -> (i32, i32) {
    %c1_i32 = arith.constant 1 : i32
    %0 = arith.muli %arg0, %c1_i32 : i32
    %1 = arith.addi %0, %arg1 : i32
    %c0_i32 = arith.constant 0 : i32
    %c0_i32_0 = arith.constant 0 : i32
    return %1, %c0_i32 : i32, i32
  }
  func.func @transform_2(%arg0: i32, %arg1: i32) -> (i32, i32) {
    %c0_i32 = arith.constant 0 : i32
    %c0_i32_0 = arith.constant 0 : i32
    return %arg0, %c0_i32 : i32, i32
  }
}

</mosaic_0001>

<bundles_post_ra>
// kernel: tpu_custom_call.1
= control target key start
LH: loop header
LB: loop body
LE: loop exit
PB: predicated region body
PF: predicated region fallthrough
CT: control target
= control target key end

     0   :  { %7 = vsyncpa [#allocation4], 0  ;;  %s223_s0 = inlined_call_operand.hbm [shape: f32[16,128], index: 0, kind: input, shape index: {}]   ;;  %s224_s1 = inlined_call_operand.hbm [shape: f32[16,128], index: 1, kind: input, shape index: {}]   ;;  %s225_s2 = inlined_call_operand.hbm [shape: f32[8,128], index: 2, kind: output, shape index: {}]  }
   0x1   :  { %8 = vsyncpa [#allocation7], 0 }
   0x2   :  { %9 = vsyncpa [#allocation5], 0  ;;  %s167_s9 = smov [#allocation3]   ;;  %s95_s13 = scalar_lea.hbm %s223_s0, 256 }
   0x3   :  { %s19_s10 = sshll.u32 %s167_s9, 4  ;;  %p96_p0 = scmp.ne.s32.totalorder %s223_s0, %s95_s13  ;;  %s20_s10 = int_to_ptr.vmem [resolvable:$true] %s19_s10 }
   0x4   :  { %p99_p1 = scmp.lt.u32.totalorder %s95_s13, %s223_s0 }
   0x6   :  { %p101_p2 = pnand %p99_p1, %p96_p0 }
   0x8   :  { %104 = shalt.err (!%p101_p2)
}
   0x9   :  { %s105_s18 = scalar_lea.vmem %s20_s10, 256  ;;  %p110_p4 = scmp.lt.s32.totalorder %s20_s10, %s20_s10 }
   0xa   :  { %p106_p3 = scmp.ne.s32.totalorder %s20_s10, %s105_s18  ;;  %p111_p5 = scmp.lt.s32.totalorder %s105_s18, %s105_s18 }
   0xc   :  { %p112_p6 = por %p111_p5, %p110_p4 }
   0xe   :  { %p113_p7 = pnand %p112_p6, %p106_p3 }
  0x10   :  { %116 = shalt.err (!%p113_p7)
}
  0x11   :  { %s168_s19 = smov 128   ;;  %s169_s20 = smov 8  }
  0x12   :  { %25 = dma.hbm_to_vmem [thread:$0]  %s223_s0, 256, %s20_s10, [#allocation4], %s168_s19, %s168_s19, %s169_s20  }
  0x13   :  { %s170_s23 = smov [#allocation6]   ;;  %s117_s27 = scalar_lea.hbm %s224_s1, 256 }
  0x14   :  { %s35_s24 = sshll.u32 %s170_s23, 4  ;;  %p118_p8 = scmp.ne.s32.totalorder %s224_s1, %s117_s27  ;;  %s36_s24 = int_to_ptr.vmem [resolvable:$true] %s35_s24 }
  0x15   :  { %p121_p9 = scmp.lt.u32.totalorder %s117_s27, %s224_s1 }
  0x17   :  { %p123_p10 = pnand %p121_p9, %p118_p8 }
  0x19   :  { %126 = shalt.err (!%p123_p10)
}
  0x1a   :  { %s127_s4 = scalar_lea.vmem %s36_s24, 256  ;;  %p132_p12 = scmp.lt.s32.totalorder %s36_s24, %s36_s24 }
  0x1b   :  { %p128_p11 = scmp.ne.s32.totalorder %s36_s24, %s127_s4  ;;  %p133_p13 = scmp.lt.s32.totalorder %s127_s4, %s127_s4 }
  0x1d   :  { %p134_p0 = por %p133_p13, %p132_p12 }
  0x1f   :  { %p135_p1 = pnand %p134_p0, %p128_p11 }
  0x21   :  { %138 = shalt.err (!%p135_p1)
}
  0x22   :  { %41 = dma.hbm_to_vmem [thread:$0]  %s224_s1, 256, %s36_s24, [#allocation7], %s168_s19, %s168_s19, %s169_s20  }
  0x23   :  { %161 = dma.done.wait [#allocation4], 256  }
  0x24   :  { %162 = vsyncadd [#allocation4], 4294967040 }
  0x25   :  { %163 = dma.done.wait [#allocation7], 256  }
  0x26   :  { %164 = vsyncadd [#allocation7], 4294967040  ;;  %v57_v0 = vld [vmem:[#allocation3] sm:$0xff]  ;;  %v58_v1 = vld [vmem:[#allocation3 + $0x8] sm:$0xff]  ;;  %s171_s6 = smov [#allocation8]  }
  0x27   :  { %v59_v2 = vld [vmem:[#allocation6] sm:$0xff]  ;;  %v60_v3 = vld [vmem:[#allocation6 + $0x8] sm:$0xff]  ;;  %s80_s7 = sshll.u32 %s171_s6, 4  ;;  %s81_s7 = int_to_ptr.vmem [resolvable:$true] %s80_s7 }
  0x28   :  { %v61_v4 = vsub.f32 %v57_v0, %v59_v2  ;;  %v62_v5 = vsub.f32 %v58_v1, %v60_v3  ;;  %s139_s8 = scalar_lea.vmem %s81_s7, 128  ;;  %p144_p3 = scmp.lt.s32.totalorder %s81_s7, %s81_s7 }
  0x29   :  { %p140_p2 = scmp.ne.s32.totalorder %s81_s7, %s139_s8  ;;  %p145_p4 = scmp.lt.s32.totalorder %s139_s8, %s139_s8 }
  0x2a   :  { %v63_v6 = vmul.f32 %v61_v4, %v61_v4  ;;  %v64_v7 = vmul.f32 %v62_v5, %v62_v5 }
  0x2b   :  { %p146_p5 = por %p145_p4, %p144_p3 }
  0x2c   :  { %v66_v8 = vadd.f32 %v64_v7, %v63_v6 }
  0x2d   :  { %p147_p6 = pnand %p146_p5, %p140_p2 }
  0x2e   :  { %73 = vst [vmem:[#allocation8] sm:$0xff] %v66_v8 }
  0x2f   :  { %150 = shalt.err (!%p147_p6)
}
  0x30   :  { %s151_s10 = scalar_lea.hbm %s225_s2, 128 }
  0x31   :  { %p152_p7 = scmp.ne.s32.totalorder %s225_s2, %s151_s10  ;;  %p155_p8 = scmp.lt.u32.totalorder %s151_s10, %s225_s2 }
  0x33   :  { %p157_p9 = pnand %p155_p8, %p152_p7 }
  0x35   :  { %160 = shalt.err (!%p157_p9)
}
  0x36   :  { %83 = dma.vmem_to_hbm [thread:$0]  %s81_s7, 128, %s225_s2, [#allocation5]  }
  0x37   :  { %165 = dma.done.wait [#allocation5], 128  }
  0x38   :  { %166 = vsyncadd [#allocation5], 4294967168 }
  0x39   :  { %87 = vsyncpa [#allocation4], 1 }
  0x3a   :  { %88 = vsyncpa [#allocation7], 1 }
  0x3b   :  { %89 = vsyncpa [#allocation5], 1 }

</bundles_post_ra>
